<compile_context>
chip_gen: v7x
topology: tpu7x:2x2x1
jax: 0.10.0
libtpu: 0.0.40
codegen_flags: <defaults>
</compile_context>

<pallas_src>
import jax
import jax.numpy as jnp
from jax.experimental import pallas as pl
from jax.experimental.pallas import tpu as pltpu


def _mask_attn_kernel(w_ref, x_ref, mask_ref, o_ref):
    # w_ref:    (C, 1)   per-output-channel conv weight (f32)
    # x_ref:    (C, TS)  feature tile (batch dim squeezed away by the BlockSpec)
    # mask_ref: (1, TS)  mask tile
    # o_ref:    (C, TS)
    w = w_ref[...]                                  # (C, 1)
    m = mask_ref[...].astype(jnp.float32)           # (1, TS)
    attn = jax.nn.sigmoid(w * m)                    # (C, TS), f32 (sigmoid on EUP)
    o_ref[...] = (x_ref[...].astype(jnp.float32) * attn).astype(o_ref.dtype)


def mask_attention(x, mask, weight, *, tile_s=None,
                   vmem_budget_bytes=8 * 1024 * 1024, max_tile_s=16384):
    """x: (B, C, D, H, W); mask: (B, 1, D, H, W); weight: (C, 1, 1, 1, 1) (Conv3d, no bias)."""
    B, C, D, H, W = x.shape
    S = D * H * W

    x2 = x.reshape(B, C, S)
    m2 = mask.reshape(B, 1, S)
    w2 = weight.reshape(C, 1).astype(jnp.float32)

    if tile_s is None:
        # Per-grid-step VMEM footprint: double-buffered (x tile + out tile + mask tile).
        itemsize = x2.dtype.itemsize
        bytes_per_lane = (2 * C + 1) * itemsize * 2
        tile_s = max(128, min(max_tile_s, int(vmem_budget_bytes // bytes_per_lane)))
        tile_s = (tile_s // 128) * 128
    if S <= tile_s:
        tile_s = S                      # one full-S block per batch; no ragged tile
    num_s = pl.cdiv(S, tile_s)          # a ragged last tile is clipped by Pallas

    grid = (B, num_s)

    # Advisory cost: read x + mask, write out; one sigmoid per output element.
    itemsize = x2.dtype.itemsize
    cost = pl.CostEstimate(
        flops=2 * B * C * S,
        transcendentals=B * C * S,
        bytes_accessed=(2 * B * C * S + B * S) * itemsize + C * 4,
    )

    out = pl.pallas_call(
        _mask_attn_kernel,
        out_shape=jax.ShapeDtypeStruct((B, C, S), x.dtype),
        grid_spec=pltpu.PrefetchScalarGridSpec(
            num_scalar_prefetch=0,
            grid=grid,
            in_specs=[
                pl.BlockSpec((C, 1), lambda b, s: (0, 0)),              # weights (whole)
                pl.BlockSpec((None, C, tile_s), lambda b, s: (b, 0, s)),  # x tile
                pl.BlockSpec((None, 1, tile_s), lambda b, s: (b, 0, s)),  # mask tile
            ],
            out_specs=pl.BlockSpec((None, C, tile_s), lambda b, s: (b, 0, s)),
        ),
        compiler_params=pltpu.CompilerParams(
            dimension_semantics=("parallel", "parallel")),
        cost_estimate=cost,
    )(w2, x2, m2)

    return out.reshape(B, C, D, H, W)


if __name__ == "__main__":
    key = jax.random.PRNGKey(0)
    k_x, k_m, k_w = jax.random.split(key, 3)

    B, C, D, H, W = 2, 4, 8, 8, 8
    x = jax.random.normal(k_x, (B, C, D, H, W), dtype=jnp.float32)
    mask = (jax.random.uniform(k_m, (B, 1, D, H, W)) > 0.5).astype(jnp.float32)
    # Deterministic Conv3d(1, C, kernel_size=1, bias=False) weight: shape (C, 1, 1, 1, 1)
    weight = jax.random.normal(k_w, (C, 1, 1, 1, 1), dtype=jnp.float32) * 0.5

    # Reference (plain JAX): out = x * sigmoid(w_c * mask)
    ref = x * jax.nn.sigmoid(weight.reshape(1, C, 1, 1, 1) * mask)

    # Default path: full-S block per batch -> grid (B, 1), minimal per-step overhead.
    out = mask_attention(x, mask, weight)
    jax.block_until_ready(out)
    assert jnp.allclose(out, ref, atol=1e-6), "mismatch vs reference (full-S path)"

    # Forced multi-tile path to exercise the spatial grid axis / index maps.
    out_tiled = mask_attention(x, mask, weight, tile_s=128)
    jax.block_until_ready(out_tiled)
    assert jnp.allclose(out_tiled, ref, atol=1e-6), "mismatch vs reference (tiled path)"

    print("KERNEL_OK")
</pallas_src>

<mosaic_0001>
module attributes {stable_mosaic.version = 11 : i64} {
  func.func @_mask_attn_kernel(%arg0: i32, %arg1: i32, %arg2: memref<4x1xf32, #tpu.memory_space<vmem>>, %arg3: memref<1x4x512xf32, #tpu.memory_space<vmem>>, %arg4: memref<1x1x512xf32, #tpu.memory_space<vmem>>, %arg5: memref<1x4x512xf32, #tpu.memory_space<vmem>>) attributes {dimension_semantics = [#tpu.dimension_semantics<parallel>, #tpu.dimension_semantics<parallel>], iteration_bounds = array<i64: 2, 1>, scalar_prefetch = 0 : i64, scratch_operands = 0 : i64, tpu.core_type = #tpu.core_type<tc>, window_params = [{pipeline_mode = #tpu.pipeline_mode<synchronous>, transform_indices = @transform_0, window_bounds = array<i64: 4, 1>}, {transform_indices = @transform_1, window_bounds = array<i64: 1, 4, 512>}, {transform_indices = @transform_2, window_bounds = array<i64: 1, 1, 512>}, {transform_indices = @transform_3, window_bounds = array<i64: 1, 4, 512>}]} {
    %c0 = arith.constant 0 : index
    %c0_0 = arith.constant 0 : index
    %0 = vector.load %arg2[%c0, %c0_0] : memref<4x1xf32, #tpu.memory_space<vmem>>, vector<4x1xf32>
    %c0_1 = arith.constant 0 : index
    %c0_2 = arith.constant 0 : index
    %c0_3 = arith.constant 0 : index
    %1 = vector.load %arg4[%c0_1, %c0_2, %c0_3] : memref<1x1x512xf32, #tpu.memory_space<vmem>>, vector<1x1x512xf32>
    %2 = vector.shape_cast %1 : vector<1x1x512xf32> to vector<1x512xf32>
    %3 = vector.broadcast %0 : vector<4x1xf32> to vector<4x512xf32>
    %4 = vector.broadcast %2 : vector<1x512xf32> to vector<4x512xf32>
    %5 = arith.mulf %3, %4 : vector<4x512xf32>
    %6 = arith.negf %5 : vector<4x512xf32>
    %7 = math.exp %6 : vector<4x512xf32>
    %cst = arith.constant 1.000000e+00 : f32
    %8 = vector.broadcast %cst : f32 to vector<4x512xf32>
    %9 = arith.addf %8, %7 : vector<4x512xf32>
    %10 = arith.divf %8, %9 : vector<4x512xf32>
    %c0_4 = arith.constant 0 : index
    %c0_5 = arith.constant 0 : index
    %c0_6 = arith.constant 0 : index
    %11 = vector.load %arg3[%c0_4, %c0_5, %c0_6] : memref<1x4x512xf32, #tpu.memory_space<vmem>>, vector<1x4x512xf32>
    %12 = vector.shape_cast %11 : vector<1x4x512xf32> to vector<4x512xf32>
    %13 = arith.mulf %12, %10 : vector<4x512xf32>
    %c0_7 = arith.constant 0 : index
    %c0_8 = arith.constant 0 : index
    %c0_9 = arith.constant 0 : index
    %14 = vector.load %arg5[%c0_7, %c0_8, %c0_9] : memref<1x4x512xf32, #tpu.memory_space<vmem>>, vector<1x4x512xf32>
    %15 = vector.shape_cast %14 : vector<1x4x512xf32> to vector<4x512xf32>
    %16 = vector.shape_cast %13 : vector<4x512xf32> to vector<1x4x512xf32>
    tpu.vector_store %arg5[%c0_7, %c0_8, %c0_9], %16 {strides = array<i32>} : memref<1x4x512xf32, #tpu.memory_space<vmem>>, vector<1x4x512xf32>,
    return
  }
  func.func @transform_0(%arg0: i32, %arg1: i32) -> (i32, i32) {
    %c0_i32 = arith.constant 0 : i32
    %c0_i32_0 = arith.constant 0 : i32
    %c0_i32_1 = arith.constant 0 : i32
    return %c0_i32, %c0_i32_0 : i32, i32
  }
  func.func @transform_1(%arg0: i32, %arg1: i32) -> (i32, i32, i32) {
    %c0_i32 = arith.constant 0 : i32
    %c0_i32_0 = arith.constant 0 : i32
    return %arg0, %c0_i32, %arg1 : i32, i32, i32
  }
  func.func @transform_2(%arg0: i32, %arg1: i32) -> (i32, i32, i32) {
    %c0_i32 = arith.constant 0 : i32
    %c0_i32_0 = arith.constant 0 : i32
    return %arg0, %c0_i32, %arg1 : i32, i32, i32
  }
  func.func @transform_3(%arg0: i32, %arg1: i32) -> (i32, i32, i32) {
    %c0_i32 = arith.constant 0 : i32
    %c0_i32_0 = arith.constant 0 : i32
    return %arg0, %c0_i32, %arg1 : i32, i32, i32
  }
}

</mosaic_0001>

<bundles_post_ra>
// kernel: tpu_custom_call.1
= control target key start
LH: loop header
LB: loop body
LE: loop exit
PB: predicated region body
PF: predicated region fallthrough
CT: control target
= control target key end

     0   :  { %8 = vsyncpa [#allocation3], 0  ;;  %s853_s0 = inlined_call_operand.vmem [shape: f32[4,1], index: 0, kind: input, shape index: {}]   ;;  %s854_s1 = inlined_call_operand.hbm [shape: f32[2,4,512], index: 1, kind: input, shape index: {}]   ;;  %s855_s2 = inlined_call_operand.vmem [shape: f32[2,1,512], index: 2, kind: input, shape index: {}]   ;;  %s856_s3 = inlined_call_operand.hbm [shape: f32[2,4,512], index: 3, kind: output, shape index: {}]  }
   0x1   :  { %10 = vsyncpa [#allocation3 + $0x1], 0 }
   0x2   :  { %11 = vsyncpa [#allocation4], 0 }
   0x3   :  { %13 = vsyncpa [#allocation4 + $0x1], 0  ;;  %s665_s12 = smov 0   ;;  %s667_s13 = smov 0  }
   0x4   :  { %s669_s14 = smov 0   ;;  %s671_s15 = smov 0  }
   0x5   :  { %s673_s16 = smov 0   ;;  %s675_s17 = smov 0  }
   0x6 LB: > { %s426_s18 = sadd.s32 4294967295, %s640_s17   ;;  %s427_s19 = sadd.s32 4294967294, %s640_s17   ;;  %s640_s17 = sphi %s675_s17, %s19_s17   ;;  %s636_s16 = sphi %s673_s16, %s872_s16   ;;  %s632_s15 = sphi %s671_s15, %s871_s15   ;;  %s628_s14 = sphi %s669_s14, %s870_s14   ;;  %s624_s13 = sphi %s667_s13, %s869_s13   ;;  %s620_s12 = sphi %s665_s12, %s868_s12  }
   0x7   : > { %s31_s20 = sadd.s32 1, %s636_s16  ;;  %s61_s21 = sadd.s32 1, %s628_s14 }
   0x8   : > { %p33_p0 = scmp.ge.s32.totalorder %s31_s20, 2  ;;  %p68_p1 = scmp.ne.s32.totalorder %s628_s14, %s624_s13 }
   0x9   : > { %p69_p2 = scmp.eq.s32.totalorder %s640_s17, 0  ;;  %p74_p3 = scmp.ne.s32.totalorder %s624_s13, %s620_s12 }
   0xa   : > { %s874_s20 = smov (%p33_p0, %s31_s20), 0  ;;  %p75_p5 = scmp.eq.s32.totalorder %s426_s18, 0 }
   0xb   : > { %p706_p4 = por %p69_p2, %p68_p1  ;;  %s56_s23 = ssub.s32 %s636_s16, %s874_s20 }
   0xc   : > { %p128_p6 = scmp.eq.s32.totalorder %s426_s18, 1  ;;  %p59_p7 = scmp.eq.s32.totalorder %s56_s23, 0 }
   0xd   : > { %p712_p8 = por %p75_p5, %p74_p3  ;;  %p134_p10 = scmp.eq.s32.totalorder %s427_s19, 1 }
   0xe   : > { %p716_p9 = por %p128_p6, %p68_p1  ;;  %p460_p13 = scmp.lt.s32.totalorder %s640_s17, 2 }
   0xf   : > { %s721_s26 = scalar_select %p59_p7, %s628_s14, %s61_s21  }
  0x10   : > { %s860_s25 = scalar_select %p716_p9, 1, 0 }
  0x11   : > { %p723_p11 = por %p134_p10, %p74_p3  ;;  %s157_s28 = sand.u32 1, %s628_s14  }
  0x12   : > { %s430_s29 = sshll.u32 %s157_s28, 4  ;;  %s446_s30 = sshll.u32 %s636_s16, 8 }
  0x13   : > { %s861_s27 = scalar_select %p723_p11, 1, 0 }
  0x14   : > { %s734_s6 = scalar_lea.hbm %s854_s1, %s446_s30  ;;  %s161_s7 = scalar_lea.vmem [#allocation2], %s430_s29 }
  0x15   : > { %s171_s8 = sshll.u32 %s161_s7, 4  ;;  %p740_p0 = pnand %p460_p13, %p706_p4  ;;  %s736_s8 = int_to_ptr.vmem [resolvable:$true] %s171_s8 }
  0x16   : > { %s158_s10 = scalar_lea.sflag [#allocation3], %s157_s28  ;;  %s528_s11 = scalar_lea.hbm %s734_s6, 256 }
  0x17   : > { %p529_p3 = scmp.ne.s32.totalorder %s734_s6, %s528_s11  ;;  %p530_p5 = pneg %p740_p0 }
  0x18   : > { %s533_s21 = scalar_lea.hbm %s854_s1, 512  ;;  %p534_p4 = scmp.lt.u32.totalorder %s734_s6, %s854_s1 }
  0x19   : > { %p531_p6 = pnand %p530_p5, %p529_p3  ;;  %p535_p10 = scmp.lt.u32.totalorder %s533_s21, %s528_s11 }
  0x1a   : > { %p537_p12 = scmp.lt.u32.totalorder %s528_s11, %s734_s6 }
  0x1b   : > { %p532_p7 = pneg %p531_p6  ;;  %p536_p13 = por %p535_p10, %p534_p4 }
  0x1d   : > { %p538_p1 = por %p537_p12, %p536_p13 }
  0x1f   : > { %p539_p2 = pnand %p538_p1, %p532_p7 }
  0x21   : > { %542 = shalt.err (!%p539_p2)
}
  0x22   : > { %s543_s28 = scalar_lea.vmem %s736_s8, 256  ;;  %s642_s29 = smov [#allocation2]  }
  0x23   : > { %p544_p3 = scmp.ne.s32.totalorder %s736_s8, %s543_s28  ;;  %s548_s30 = sshll.u32 %s642_s29, 4  ;;  %s549_s30 = int_to_ptr.vmem [resolvable:$false] %s548_s30 }
  0x24   : > { %s550_s4 = scalar_lea.vmem %s549_s30, 512  ;;  %p551_p9 = scmp.lt.s32.totalorder %s736_s8, %s549_s30 }
  0x25   : > { %p546_p6 = pnand %p544_p3, %p530_p5  ;;  %p552_p4 = scmp.lt.s32.totalorder %s550_s4, %s543_s28 }
  0x27   : > { %p547_p11 = pneg %p546_p6  ;;  %p553_p10 = por %p552_p4, %p551_p9 }
  0x29   : > { %p554_p12 = pnand %p553_p10, %p547_p11 }
  0x2b   : > { %557 = shalt.err (!%p554_p12)
}
  0x2c   : > { %455 = dma.hbm_to_vmem [thread:$0]  (!%p740_p0), %s734_s6, 256, %s736_s8, %s158_s10  }
  0x2d   : > { %p863_p1 = scmp.lt.s32.totalorder %s640_s17, 3  ;;  %p864_p2 = scmp.ge.s32.totalorder %s640_s17, 1 }
  0x2f   : > { %p189_p5 = pnand %p864_p2, %p863_p1 }
  0x30   : > { %s776_s5 = sand.u32 (!%p189_p5), 1, %s624_s13  }
  0x31   : > { %192 = sbr.rel (%p189_p5) target bundleno = 236 (0xec), region = 32  ;;  %s434_s7 = sshll.u32 (!%p189_p5), %s776_s5, 4 }
  0x32   : > { %s195_s11 = scalar_lea.sflag (!%p189_p5), [#allocation3], %s776_s5  ;;  %s782_s9 = scalar_lea.vmem (!%p189_p5), [#allocation2], %s434_s7 }
  0x38   : > { %611 = dma.done.wait (%p712_p8), %s195_s11, 256  }
  0x39   : > { %613 = vsyncadd (%p712_p8), %s195_s11, 4294967040  ;;  %v643_v0 = vmov 0   ;;  %v240_v1 = vld [vmem:[%s853_s0] sm:$0xf]  ;;  %p231_p9 = scmp.lt.s32.totalorder %s632_s15, 1  ;;  %v248_v2 = vlaneseq  ;;  %v297_v36 = vld [vmem:[%s782_s9 + $0x8] sm:$0xff] }
  0x3a   : > { %511 = vset.pattern.permute.xlu0 %v643_v0  ;;  %v296_v32 = vld [vmem:[%s782_s9] sm:$0xff]  ;;  %s447_s24 = sshll.u32 %s632_s15, 8  ;;  %s228_s23 = scalar_lea.vmem [#allocation5], %s434_s7 }
  0x3b   : > { %244 = vperm.xlu0 %511, %v240_v1   ;;  %s232_s10 = scalar_select %p231_p9, %s632_s15, 1  ;;  %v249_v3 = vshrl.u32 %v248_v2, 7 }
  0x3c   : > { %s327_s28 = sshll.u32 %s228_s23, 4  ;;  %s804_s4 = scalar_lea.hbm %s856_s3, %s447_s24  ;;  %s806_s28 = int_to_ptr.vmem [resolvable:$true] %s327_s28 }
  0x3d   : > { %s436_s18 = sshll.u32 %s232_s10, 2  ;;  %v250_v4 = vsub.s32 0, %v249_v3  ;;  %v254_v5 = vsub.s32 1, %v249_v3  ;;  %v258_v6 = vsub.s32 2, %v249_v3  ;;  %v262_v7 = vsub.s32 3, %v249_v3  ;;  %s311_s11 = scalar_lea.sflag [#allocation4], %s776_s5 }
  0x3e   : > { %s237_s22 = scalar_lea.vmem %s855_s2, %s436_s18  ;;  %s558_s15 = scalar_lea.vmem %s806_s28, 256 }
  0x3f   : > { %v241_v8 = vld [vmem:[%s237_s22] sm:$0xf]  ;;  %p559_p8 = scmp.ne.s32.totalorder %s806_s28, %s558_s15  ;;  %p865_p11 = scmp.ne.s32.totalorder %s860_s25, 0 }
  0x40   : > { %v251_v9 = vrot.slane %v241_v8, %v250_v4  ;;  %v255_v10 = vrot.slane %v241_v8, %v254_v5  ;;  %v259_v11 = vrot.slane %v241_v8, %v258_v6  ;;  %v263_v12 = vrot.slane %v241_v8, %v262_v7  ;;  %s644_s7 = smov [#allocation5]  }
  0x41   : > { %p560_p0 = pnand %p559_p8, %p865_p11  ;;  %s562_s9 = sshll.u32 %s644_s7, 4  ;;  %s563_s9 = int_to_ptr.vmem [resolvable:$false] %s562_s9 }
  0x42   : > { %s564_s6 = scalar_lea.vmem %s563_s9, 512  ;;  %p565_p13 = scmp.lt.s32.totalorder %s806_s28, %s563_s9 }
  0x43   : > { %p561_p7 = pneg %p560_p0  ;;  %p566_p3 = scmp.lt.s32.totalorder %s564_s6, %s558_s15 }
  0x45   : > { %p567_p6 = por %p566_p3, %p565_p13 }
  0x47   : > { %p568_p4 = pnand %p567_p6, %p561_p7 }
  0xba   : > { %v245_v13 = vpop.permute.xlu0 %244 }
  0xbb   : > { %v268_v14 = vmul.f32 %v251_v9, %v245_v13  ;;  %v269_v15 = vmul.f32 %v255_v10, %v245_v13  ;;  %v270_v16 = vmul.f32 %v259_v11, %v245_v13  ;;  %v271_v17 = vmul.f32 %v263_v12, %v245_v13 }
  0xbd   : > { %v437_v18 = vmul.f32 -1.442695, %v268_v14  ;;  %v438_v19 = vmul.f32 -1.442695, %v269_v15  ;;  %v439_v20 = vmul.f32 -1.442695, %v270_v16 }
  0xbe   : > { %v440_v21 = vmul.f32 -1.442695, %v271_v17 }
  0xbf   : > { %512 = vpow2.f32 %v437_v18 }
  0xc0   : > { %514 = vpow2.f32 %v438_v19 }
  0xc1   : > { %516 = vpow2.f32 %v439_v20 }
  0xc2   : > { %518 = vpow2.f32 %v440_v21 }
  0xc9   : > { %v513_v22 = vpop.eup %512 }
  0xca   : > { %v515_v23 = vpop.eup %514  ;;  %v284_v24 = vadd.f32 1.0, %v513_v22 }
  0xcb   : > { %v517_v25 = vpop.eup %516  ;;  %v285_v26 = vadd.f32 1.0, %v515_v23 }
  0xcc   : > { %v519_v27 = vpop.eup %518  ;;  %v286_v28 = vadd.f32 1.0, %v517_v25  ;;  %520 = vrcp.f32 %v284_v24 }
  0xcd   : > { %v287_v29 = vadd.f32 1.0, %v519_v27  ;;  %522 = vrcp.f32 %v285_v26 }
  0xce   : > { %524 = vrcp.f32 %v286_v28 }
  0xcf   : > { %526 = vrcp.f32 %v287_v29 }
  0xd6   : > { %v521_v30 = vpop.eup %520 }
  0xd7   : > { %v523_v31 = vpop.eup %522 }
  0xd8   : > { %v525_v33 = vpop.eup %524  ;;  %v302_v34 = vcombine.low %v521_v30, %v523_v31 }
  0xd9   : > { %v527_v35 = vpop.eup %526 }
  0xda   : > { %v303_v37 = vcombine.low %v525_v33, %v527_v35  ;;  %v306_v38 = vmul.f32 %v302_v34, %v296_v32 }
  0xdc   : > { %v307_v39 = vmul.f32 %v303_v37, %v297_v36  ;;  %308 = vst [vmem:[%s228_s23] sm:$0xff] %v306_v38 }
  0xde   : > { %309 = vst [vmem:[%s228_s23 + $0x8] sm:$0xff] %v307_v39 }
  0xdf   : > { %571 = shalt.err (!%p568_p4)
}
  0xe0   : > { %s572_s5 = scalar_lea.hbm %s804_s4, 256  ;;  %s576_s18 = scalar_lea.hbm %s856_s3, 512 }
  0xe1   : > { %p573_p10 = scmp.ne.s32.totalorder %s804_s4, %s572_s5  ;;  %p577_p2 = scmp.lt.u32.totalorder %s804_s4, %s856_s3 }
  0xe2   : > { %p578_p5 = scmp.lt.u32.totalorder %s576_s18, %s572_s5  ;;  %p580_p8 = scmp.lt.u32.totalorder %s572_s5, %s804_s4 }
  0xe3   : > { %p574_p12 = pnand %p573_p10, %p865_p11 }
  0xe4   : > { %p579_p9 = por %p578_p5, %p577_p2 }
  0xe5   : > { %p575_p1 = pneg %p574_p12 }
  0xe6   : > { %p581_p0 = por %p580_p8, %p579_p9 }
  0xe8   : > { %p582_p7 = pnand %p581_p0, %p575_p1 }
  0xea   : > { %585 = shalt.err (!%p582_p7)
}
  0xeb   : > { %450 = dma.vmem_to_hbm [thread:$0]  (%p865_p11), %s806_s28, 256, %s804_s4, %s311_s11  }
  0xec PF: > { %s339_s22 = sand.u32 1, %s620_s12   ;;  %p866_p13 = scmp.ne.s32.totalorder %s861_s27, 0 }
  0xed   : > { %p867_p3 = scmp.ge.s32.totalorder %s640_s17, 2  ;;  %s340_s24 = scalar_lea.sflag [#allocation4], %s339_s22 }
  0xef   : > { %p457_p6 = pnand %p867_p3, %p866_p13 }
  0xf1   : > { %615 = dma.done.wait (!%p457_p6), %s340_s24, 256  }
  0xf2   : > { %617 = vsyncadd (!%p457_p6), %s340_s24, 4294967040  ;;  %s19_s17 = sadd.s32 1, %s640_s17   ;;  %s868_s12 = smov %s624_s13 }
  0xf3   : > { %p16_p4 = scmp.ge.s32.totalorder %s19_s17, 4   ;;  %s869_s13 = smov %s628_s14 }
  0xf4   : > { %s870_s14 = smov %s721_s26  ;;  %s871_s15 = smov %s636_s16 }
  0xf5   : > { %s872_s16 = smov %s874_s20  ;;  %18 = sbr.rel (!%p16_p4) target bundleno = 6 (0x6), region = 80 }
  0xfc   :  { %345 = vsyncpa [#allocation3], 1 }
  0xfd   :  { %347 = vsyncpa [#allocation3 + $0x1], 1 }
  0xfe   :  { %348 = vsyncpa [#allocation4], 1 }
  0xff   :  { %350 = vsyncpa [#allocation4 + $0x1], 1 }

</bundles_post_ra>
